<compile_context>
chip_gen: v5e
topology: v5e:2x2
jax: 0.10.0
libtpu: 0.0.40
codegen_flags: <defaults>
</compile_context>

<pallas_src>
import jax
import jax.numpy as jnp
import numpy as np
from jax.experimental import pallas as pl
from jax.experimental.pallas import tpu as pltpu

IGNORE_LABEL = 100
EPSILON = 1e-6
MARGIN = 10.0


def _round_up(x, m):
    return ((x + m - 1) // m) * m


def _contrastive_dist_kernel(
    nvalid_ref,                  # scalar prefetch (SMEM), (1,) int32: number of valid rows
    xi_ref,                      # (tm, d)  f32   row-tile features (resident over j)
    xjt_ref,                     # (d, tn)  f32   streamed column tile, pre-transposed
    li_ref,                      # (tm, 1)  int32 row labels
    ljt_ref,                     # (1, tn)  int32 column labels (pre-transposed)
    sqi_ref,                     # (tm, 1)  f32   row ||x||^2
    sqjt_ref,                    # (1, tn)  f32   column ||x||^2 (pre-transposed)
    num_ref, den_ref,            # (tm, 1)  f32   outputs: relu(loss)*include, include
    s_acc, v_acc, c_acc,         # (tm, lane_w) f32 lane-wide VMEM accumulators
):
    j = pl.program_id(1)

    @pl.when(j == 0)
    def _init():
        s_acc[...] = jnp.zeros_like(s_acc)
        v_acc[...] = jnp.zeros_like(v_acc)
        c_acc[...] = jnp.zeros_like(c_acc)

    li = li_ref[...]                                            # (tm, 1)
    ljt = ljt_ref[...]                                          # (1, tn)
    valid_i = (li != IGNORE_LABEL).astype(jnp.float32)          # (tm, 1)
    valid_jt = (ljt != IGNORE_LABEL).astype(jnp.float32)        # (1, tn)

    # Gram tile on the MXU: (tm, d) @ (d, tn).  The streamed operand is transposed
    # once in the wrapper, so no per-step transpose is needed here.
    g = jnp.dot(xi_ref[...], xjt_ref[...], preferred_element_type=jnp.float32)

    # ||xi - xj||^2 via the norm identity; clamp tiny negative cancellation values.
    ed = jnp.maximum(sqi_ref[...] + sqjt_ref[...] - 2.0 * g, 0.0)   # (tm, tn)

    eq = (li == ljt).astype(jnp.float32)                        # (tm, tn)
    vp = valid_i * valid_jt                                     # valid-pair mask
    same = eq * vp          # includes diagonal; ed[i,i] ~ 0 so only counts need fixing
    ved = vp * ed
    sed = eq * ved

    # Fold tn columns down to lane_w lanes with lane-aligned VPU adds; the cross-lane
    # (XLU) reduction is deferred to the finalize step (once per i-tile).
    tn = ed.shape[1]
    lane_w = s_acc.shape[1]

    def _fold(x):
        acc = x[:, 0:lane_w]
        for k in range(1, tn // lane_w):
            acc = acc + x[:, k * lane_w:(k + 1) * lane_w]
        return acc

    s_acc[...] += _fold(sed)
    v_acc[...] += _fold(ved)
    c_acc[...] += _fold(same)

    @pl.when(j == pl.num_programs(1) - 1)
    def _finalize():
        n_valid = nvalid_ref[0].astype(jnp.float32)
        s_sum = jnp.sum(s_acc[...], axis=1, keepdims=True)      # (tm, 1)
        v_sum = jnp.sum(v_acc[...], axis=1, keepdims=True)
        c_sum = jnp.sum(c_acc[...], axis=1, keepdims=True)
        counts = c_sum - valid_i                                # remove the self-match
        d_sum = v_sum - s_sum
        # Exact division: runs once per i-tile, so approx reciprocal buys nothing.
        loss = (s_sum / (counts + EPSILON)
                - d_sum / (n_valid - counts - 1.0 + EPSILON)
                + MARGIN)                                       # (tm, 1)
        include = valid_i * (counts > 0.5).astype(jnp.float32)  # counts is exact int-valued f32
        num_ref[...] = jnp.maximum(loss, 0.0) * include
        den_ref[...] = include


def contrastive_dist(features, labels):
    """features: (n, d) float; labels: (n,) int. Returns scalar float32 loss."""
    features = features.astype(jnp.float32)
    labels = labels.astype(jnp.int32)
    n, d = features.shape

    # Tile selection: single tile for small n; (256, 512) streamed tiles otherwise
    # (multiples of 256 to fill the v6e/v7x MXU; on v5e tm=512 is preferable for HBM).
    # NOTE: MXU inputs kept in f32 for fidelity; bf16 Gram inputs are an optional
    # v6e/v7x speedup for large d once validated against the reference tolerance.
    if n <= 256:
        tm = tn = _round_up(max(n, 8), 8)
        n_pad = tm
    else:
        tm, tn = 256, 512
        n_pad = _round_up(n, 512)          # lcm(tm, tn)
    pad = n_pad - n

    # Lane width of the in-kernel accumulators: 128 when tn is 128-aligned,
    # otherwise the whole (small, single-tile) tn.
    lane_w = 128 if tn % 128 == 0 else tn

    feat_p = jnp.pad(features, ((0, pad), (0, 0)))
    lab_p = jnp.pad(labels, (0, pad), constant_values=IGNORE_LABEL)

    feat_t = feat_p.T                                   # (d, n_pad): one-time HBM copy,
    lab_col = lab_p.reshape(n_pad, 1)                   # avoids any per-step transpose
    lab_row = lab_p.reshape(1, n_pad)                   # pre-transposed labels
    sq = jnp.sum(feat_p * feat_p, axis=-1)              # row squared norms (hoisted)
    sq_col = sq.reshape(n_pad, 1)
    sq_row = sq.reshape(1, n_pad)                       # pre-transposed norms
    n_valid = jnp.sum(labels != IGNORE_LABEL).astype(jnp.int32).reshape(1)

    grid = (n_pad // tm, n_pad // tn)

    # VMEM budget: double-buffered xi + streamed xjT + (tm, tn) temporaries + accs.
    vmem_est = 4 * (2 * tm * d + 3 * d * tn + 10 * tm * tn
                    + 3 * tm * lane_w + 16 * (tm + tn))
    try:
        vmem_cap = int(pltpu.get_tpu_info().vmem_capacity_bytes)
    except Exception:
        vmem_cap = 64 * 1024 * 1024                     # conservative (v7x) fallback
    # Cap at 48 MiB: leaves headroom on v7x (64 MiB physical VMEM per TC) and is far
    # more than this kernel ever needs on v5e/v6e (128 MiB).
    vmem_limit = int(min(max(32 * 1024 * 1024, 2 * vmem_est),
                         48 * 1024 * 1024, (3 * vmem_cap) // 4))

    cost = pl.CostEstimate(
        flops=int(2 * n_pad * n_pad * d + 10 * n_pad * n_pad),
        transcendentals=0,
        bytes_accessed=int(4 * (n_pad * d * (1 + grid[0]) + 8 * n_pad)),
    )

    num, den = pl.pallas_call(
        _contrastive_dist_kernel,
        out_shape=(
            jax.ShapeDtypeStruct((n_pad, 1), jnp.float32),
            jax.ShapeDtypeStruct((n_pad, 1), jnp.float32),
        ),
        grid_spec=pltpu.PrefetchScalarGridSpec(
            num_scalar_prefetch=1,
            grid=grid,
            in_specs=[
                pl.BlockSpec((tm, d), lambda i, j, nv: (i, 0)),   # x_i tile (resident over j)
                pl.BlockSpec((d, tn), lambda i, j, nv: (0, j)),   # x_j^T tile (streamed)
                pl.BlockSpec((tm, 1), lambda i, j, nv: (i, 0)),   # labels_i
                pl.BlockSpec((1, tn), lambda i, j, nv: (0, j)),   # labels_j (pre-transposed)
                pl.BlockSpec((tm, 1), lambda i, j, nv: (i, 0)),   # ||x_i||^2
                pl.BlockSpec((1, tn), lambda i, j, nv: (0, j)),   # ||x_j||^2 (pre-transposed)
            ],
            out_specs=(
                pl.BlockSpec((tm, 1), lambda i, j, nv: (i, 0)),
                pl.BlockSpec((tm, 1), lambda i, j, nv: (i, 0)),
            ),
            scratch_shapes=[
                pltpu.VMEM((tm, lane_w), jnp.float32),   # S accumulator (same-class)
                pltpu.VMEM((tm, lane_w), jnp.float32),   # V accumulator (all valid pairs)
                pltpu.VMEM((tm, lane_w), jnp.float32),   # counts accumulator
            ],
        ),
        compiler_params=pltpu.CompilerParams(
            dimension_semantics=("parallel", "arbitrary"),
            vmem_limit_bytes=vmem_limit,
        ),
        cost_estimate=cost,
    )(n_valid, feat_p, feat_t, lab_col, lab_row, sq_col, sq_row)

    # Tiny final reduction (mean over rows with counts != 0) done outside the kernel.
    # NOTE: if no row has a same-class partner, this returns NaN (matches the
    # reference's mean-of-empty behavior).
    return jnp.sum(num) / jnp.sum(den)


def _reference(features, labels):
    """Pure-JAX reproduction of the PyTorch module (eager, dynamic-shape filtering)."""
    keep = labels != IGNORE_LABEL
    f = features[keep].astype(jnp.float32)
    l = labels[keep]
    nv = f.shape[0]
    diff = f[:, None, :] - f[None, :, :]
    ed = jnp.sum(diff * diff, axis=-1)
    eq = (l[None, :] == l[:, None]).astype(jnp.float32)
    counts = jnp.sum(eq, axis=1, keepdims=True) - 1.0
    w = eq / (counts + EPSILON) - (1.0 - eq) / (nv - counts - 1.0 + EPSILON)
    w = w * (1.0 - jnp.eye(nv, dtype=jnp.float32))
    loss = jnp.sum(w * ed, axis=1) + MARGIN
    lv = loss[counts[:, 0] != 0]
    return jnp.mean(jnp.maximum(lv, 0.0))


if __name__ == "__main__":
    key = jax.random.PRNGKey(0)
    n, d = 8, 32
    features = jax.random.normal(key, (n, d), dtype=jnp.float32)
    # Three classes plus one ignored (label == 100) row.
    labels = jnp.array([0, 0, 1, 1, 2, 2, 0, IGNORE_LABEL], dtype=jnp.int32)

    loss = contrastive_dist(features, labels)
    jax.block_until_ready(loss)

    ref = _reference(features, labels)
    if not np.allclose(np.asarray(loss), np.asarray(ref), rtol=5e-2, atol=5e-2):
        raise AssertionError(f"mismatch: kernel={float(loss)} ref={float(ref)}")
    print("KERNEL_OK")
</pallas_src>

<mosaic_0001>
module attributes {stable_mosaic.version = 11 : i64} {
  func.func @_contrastive_dist_kernel(%arg0: i32, %arg1: i32, %arg2: memref<1xi32, #tpu.memory_space<smem>>, %arg3: memref<8x32xf32, #tpu.memory_space<vmem>>, %arg4: memref<32x8xf32, #tpu.memory_space<vmem>>, %arg5: memref<8x1xi32, #tpu.memory_space<vmem>>, %arg6: memref<1x8xi32, #tpu.memory_space<vmem>>, %arg7: memref<8x1xf32, #tpu.memory_space<vmem>>, %arg8: memref<1x8xf32, #tpu.memory_space<vmem>>, %arg9: memref<8x1xf32, #tpu.memory_space<vmem>>, %arg10: memref<8x1xf32, #tpu.memory_space<vmem>>, %arg11: memref<8x8xf32, #tpu.memory_space<vmem>>, %arg12: memref<8x8xf32, #tpu.memory_space<vmem>>, %arg13: memref<8x8xf32, #tpu.memory_space<vmem>>) attributes {dimension_semantics = [#tpu.dimension_semantics<parallel>, #tpu.dimension_semantics<arbitrary>], iteration_bounds = array<i64: 1, 1>, scalar_prefetch = 1 : i64, scratch_operands = 3 : i64, tpu.core_type = #tpu.core_type<tc>, window_params = [{transform_indices = @transform_0, window_bounds = array<i64: 8, 32>}, {transform_indices = @transform_1, window_bounds = array<i64: 32, 8>}, {transform_indices = @transform_2, window_bounds = array<i64: 8, 1>}, {transform_indices = @transform_3, window_bounds = array<i64: 1, 8>}, {transform_indices = @transform_4, window_bounds = array<i64: 8, 1>}, {transform_indices = @transform_5, window_bounds = array<i64: 1, 8>}, {transform_indices = @transform_6, window_bounds = array<i64: 8, 1>}, {transform_indices = @transform_7, window_bounds = array<i64: 8, 1>}]} {
    %c0_i32 = arith.constant 0 : i32
    %0 = arith.cmpi eq, %arg1, %c0_i32 : i32
    %1 = arith.extui %0 : i1 to i32
    %c0_i32_0 = arith.constant 0 : i32
    %2 = arith.cmpi ne, %1, %c0_i32_0 : i32
    scf.if %2 {
      %cst_29 = arith.constant 0.000000e+00 : f32
      %49 = vector.broadcast %cst_29 : f32 to vector<8x8xf32>
      %c0_30 = arith.constant 0 : index
      %c0_31 = arith.constant 0 : index
      %50 = vector.load %arg11[%c0_30, %c0_31] : memref<8x8xf32, #tpu.memory_space<vmem>>, vector<8x8xf32>
      tpu.vector_store %arg11[%c0_30, %c0_31], %49 {strides = array<i32>} : memref<8x8xf32, #tpu.memory_space<vmem>>, vector<8x8xf32>,
      %cst_32 = arith.constant 0.000000e+00 : f32
      %51 = vector.broadcast %cst_32 : f32 to vector<8x8xf32>
      %c0_33 = arith.constant 0 : index
      %c0_34 = arith.constant 0 : index
      %52 = vector.load %arg12[%c0_33, %c0_34] : memref<8x8xf32, #tpu.memory_space<vmem>>, vector<8x8xf32>
      tpu.vector_store %arg12[%c0_33, %c0_34], %51 {strides = array<i32>} : memref<8x8xf32, #tpu.memory_space<vmem>>, vector<8x8xf32>,
      %cst_35 = arith.constant 0.000000e+00 : f32
      %53 = vector.broadcast %cst_35 : f32 to vector<8x8xf32>
      %c0_36 = arith.constant 0 : index
      %c0_37 = arith.constant 0 : index
      %54 = vector.load %arg13[%c0_36, %c0_37] : memref<8x8xf32, #tpu.memory_space<vmem>>, vector<8x8xf32>
      tpu.vector_store %arg13[%c0_36, %c0_37], %53 {strides = array<i32>} : memref<8x8xf32, #tpu.memory_space<vmem>>, vector<8x8xf32>,
    } else {
    }
    %c0 = arith.constant 0 : index
    %c0_1 = arith.constant 0 : index
    %3 = vector.load %arg5[%c0, %c0_1] : memref<8x1xi32, #tpu.memory_space<vmem>>, vector<8x1xi32>
    %c0_2 = arith.constant 0 : index
    %c0_3 = arith.constant 0 : index
    %4 = vector.load %arg6[%c0_2, %c0_3] : memref<1x8xi32, #tpu.memory_space<vmem>>, vector<1x8xi32>
    %c100_i32 = arith.constant 100 : i32
    %5 = vector.broadcast %c100_i32 : i32 to vector<8x1xi32>
    %6 = arith.cmpi ne, %3, %5 : vector<8x1xi32>
    %7 = arith.extui %6 : vector<8x1xi1> to vector<8x1xi32>
    %8 = arith.sitofp %7 : vector<8x1xi32> to vector<8x1xf32>
    %c100_i32_4 = arith.constant 100 : i32
    %9 = vector.broadcast %c100_i32_4 : i32 to vector<1x8xi32>
    %10 = arith.cmpi ne, %4, %9 : vector<1x8xi32>
    %11 = arith.extui %10 : vector<1x8xi1> to vector<1x8xi32>
    %12 = arith.sitofp %11 : vector<1x8xi32> to vector<1x8xf32>
    %c0_5 = arith.constant 0 : index
    %c0_6 = arith.constant 0 : index
    %13 = vector.load %arg3[%c0_5, %c0_6] : memref<8x32xf32, #tpu.memory_space<vmem>>, vector<8x32xf32>
    %c0_7 = arith.constant 0 : index
    %c0_8 = arith.constant 0 : index
    %14 = vector.load %arg4[%c0_7, %c0_8] : memref<32x8xf32, #tpu.memory_space<vmem>>, vector<32x8xf32>
    %cst = arith.constant dense<0.000000e+00> : vector<8x8xf32>
    %15 = tpu.matmul %13, %14, %cst {dimension_numbers = #tpu.dot_dimension_numbers<[1], [0], [0], [1], [0, 0, 1, 1], [], []>} : vector<8x32xf32>, vector<32x8xf32>, vector<8x8xf32> -> vector<8x8xf32>
    %c0_9 = arith.constant 0 : index
    %c0_10 = arith.constant 0 : index
    %16 = vector.load %arg7[%c0_9, %c0_10] : memref<8x1xf32, #tpu.memory_space<vmem>>, vector<8x1xf32>
    %c0_11 = arith.constant 0 : index
    %c0_12 = arith.constant 0 : index
    %17 = vector.load %arg8[%c0_11, %c0_12] : memref<1x8xf32, #tpu.memory_space<vmem>>, vector<1x8xf32>
    %18 = vector.broadcast %16 : vector<8x1xf32> to vector<8x8xf32>
    %19 = vector.broadcast %17 : vector<1x8xf32> to vector<8x8xf32>
    %20 = arith.addf %18, %19 : vector<8x8xf32>
    %cst_13 = arith.constant 2.000000e+00 : f32
    %21 = vector.broadcast %cst_13 : f32 to vector<8x8xf32>
    %22 = arith.mulf %21, %15 : vector<8x8xf32>
    %23 = arith.subf %20, %22 : vector<8x8xf32>
    %cst_14 = arith.constant 0.000000e+00 : f32
    %24 = vector.broadcast %cst_14 : f32 to vector<8x8xf32>
    %25 = arith.maximumf %23, %24 : vector<8x8xf32>
    %26 = vector.broadcast %3 : vector<8x1xi32> to vector<8x8xi32>
    %27 = vector.broadcast %4 : vector<1x8xi32> to vector<8x8xi32>
    %28 = arith.cmpi eq, %26, %27 : vector<8x8xi32>
    %29 = arith.extui %28 : vector<8x8xi1> to vector<8x8xi32>
    %30 = arith.sitofp %29 : vector<8x8xi32> to vector<8x8xf32>
    %31 = vector.broadcast %8 : vector<8x1xf32> to vector<8x8xf32>
    %32 = vector.broadcast %12 : vector<1x8xf32> to vector<8x8xf32>
    %33 = arith.mulf %31, %32 : vector<8x8xf32>
    %34 = arith.mulf %30, %33 : vector<8x8xf32>
    %35 = arith.mulf %33, %25 : vector<8x8xf32>
    %36 = arith.mulf %30, %35 : vector<8x8xf32>
    %c0_15 = arith.constant 0 : index
    %c0_16 = arith.constant 0 : index
    %37 = vector.load %arg11[%c0_15, %c0_16] : memref<8x8xf32, #tpu.memory_space<vmem>>, vector<8x8xf32>
    %38 = arith.addf %37, %36 : vector<8x8xf32>
    %c0_17 = arith.constant 0 : index
    %c0_18 = arith.constant 0 : index
    %39 = vector.load %arg11[%c0_17, %c0_18] : memref<8x8xf32, #tpu.memory_space<vmem>>, vector<8x8xf32>
    tpu.vector_store %arg11[%c0_17, %c0_18], %38 {strides = array<i32>} : memref<8x8xf32, #tpu.memory_space<vmem>>, vector<8x8xf32>,
    %c0_19 = arith.constant 0 : index
    %c0_20 = arith.constant 0 : index
    %40 = vector.load %arg12[%c0_19, %c0_20] : memref<8x8xf32, #tpu.memory_space<vmem>>, vector<8x8xf32>
    %41 = arith.addf %40, %35 : vector<8x8xf32>
    %c0_21 = arith.constant 0 : index
    %c0_22 = arith.constant 0 : index
    %42 = vector.load %arg12[%c0_21, %c0_22] : memref<8x8xf32, #tpu.memory_space<vmem>>, vector<8x8xf32>
    tpu.vector_store %arg12[%c0_21, %c0_22], %41 {strides = array<i32>} : memref<8x8xf32, #tpu.memory_space<vmem>>, vector<8x8xf32>,
    %c0_23 = arith.constant 0 : index
    %c0_24 = arith.constant 0 : index
    %43 = vector.load %arg13[%c0_23, %c0_24] : memref<8x8xf32, #tpu.memory_space<vmem>>, vector<8x8xf32>
    %44 = arith.addf %43, %34 : vector<8x8xf32>
    %c0_25 = arith.constant 0 : index
    %c0_26 = arith.constant 0 : index
    %45 = vector.load %arg13[%c0_25, %c0_26] : memref<8x8xf32, #tpu.memory_space<vmem>>, vector<8x8xf32>
    tpu.vector_store %arg13[%c0_25, %c0_26], %44 {strides = array<i32>} : memref<8x8xf32, #tpu.memory_space<vmem>>, vector<8x8xf32>,
    %c0_i32_27 = arith.constant 0 : i32
    %46 = arith.cmpi eq, %arg1, %c0_i32_27 : i32
    %47 = arith.extui %46 : i1 to i32
    %c0_i32_28 = arith.constant 0 : i32
    %48 = arith.cmpi ne, %47, %c0_i32_28 : i32
    scf.if %48 {
      %c0_29 = arith.constant 0 : index
      %49 = memref.load %arg2[%c0_29] : memref<1xi32, #tpu.memory_space<smem>>
      %50 = arith.sitofp %49 : i32 to f32
      %c0_30 = arith.constant 0 : index
      %c0_31 = arith.constant 0 : index
      %51 = vector.load %arg11[%c0_30, %c0_31] : memref<8x8xf32, #tpu.memory_space<vmem>>, vector<8x8xf32>
      %cst_32 = arith.constant dense<0.000000e+00> : vector<8xf32>
      %52 = vector.multi_reduction <add>, %51, %cst_32 [1] : vector<8x8xf32> to vector<8xf32>
      %53 = vector.shape_cast %52 : vector<8xf32> to vector<8x1xf32>
      %c0_33 = arith.constant 0 : index
      %c0_34 = arith.constant 0 : index
      %54 = vector.load %arg12[%c0_33, %c0_34] : memref<8x8xf32, #tpu.memory_space<vmem>>, vector<8x8xf32>
      %cst_35 = arith.constant dense<0.000000e+00> : vector<8xf32>
      %55 = vector.multi_reduction <add>, %54, %cst_35 [1] : vector<8x8xf32> to vector<8xf32>
      %56 = vector.shape_cast %55 : vector<8xf32> to vector<8x1xf32>
      %c0_36 = arith.constant 0 : index
      %c0_37 = arith.constant 0 : index
      %57 = vector.load %arg13[%c0_36, %c0_37] : memref<8x8xf32, #tpu.memory_space<vmem>>, vector<8x8xf32>
      %cst_38 = arith.constant dense<0.000000e+00> : vector<8xf32>
      %58 = vector.multi_reduction <add>, %57, %cst_38 [1] : vector<8x8xf32> to vector<8xf32>
      %59 = vector.shape_cast %58 : vector<8xf32> to vector<8x1xf32>
      %60 = arith.subf %59, %8 : vector<8x1xf32>
      %61 = arith.subf %56, %53 : vector<8x1xf32>
      %cst_39 = arith.constant 9.99999997E-7 : f32
      %62 = vector.broadcast %cst_39 : f32 to vector<8x1xf32>
      %63 = arith.addf %60, %62 : vector<8x1xf32>
      %64 = arith.divf %53, %63 : vector<8x1xf32>
      %65 = vector.broadcast %50 : f32 to vector<8x1xf32>
      %66 = arith.subf %65, %60 : vector<8x1xf32>
      %cst_40 = arith.constant 1.000000e+00 : f32
      %67 = vector.broadcast %cst_40 : f32 to vector<8x1xf32>
      %68 = arith.subf %66, %67 : vector<8x1xf32>
      %cst_41 = arith.constant 9.99999997E-7 : f32
      %69 = vector.broadcast %cst_41 : f32 to vector<8x1xf32>
      %70 = arith.addf %68, %69 : vector<8x1xf32>
      %71 = arith.divf %61, %70 : vector<8x1xf32>
      %72 = arith.subf %64, %71 : vector<8x1xf32>
      %cst_42 = arith.constant 1.000000e+01 : f32
      %73 = vector.broadcast %cst_42 : f32 to vector<8x1xf32>
      %74 = arith.addf %72, %73 : vector<8x1xf32>
      %cst_43 = arith.constant 5.000000e-01 : f32
      %75 = vector.broadcast %cst_43 : f32 to vector<8x1xf32>
      %76 = arith.cmpf ogt, %60, %75 : vector<8x1xf32>
      %77 = arith.extui %76 : vector<8x1xi1> to vector<8x1xi32>
      %78 = arith.sitofp %77 : vector<8x1xi32> to vector<8x1xf32>
      %79 = arith.mulf %8, %78 : vector<8x1xf32>
      %cst_44 = arith.constant 0.000000e+00 : f32
      %80 = vector.broadcast %cst_44 : f32 to vector<8x1xf32>
      %81 = arith.maximumf %74, %80 : vector<8x1xf32>
      %82 = arith.mulf %81, %79 : vector<8x1xf32>
      %c0_45 = arith.constant 0 : index
      %c0_46 = arith.constant 0 : index
      %83 = vector.load %arg9[%c0_45, %c0_46] : memref<8x1xf32, #tpu.memory_space<vmem>>, vector<8x1xf32>
      tpu.vector_store %arg9[%c0_45, %c0_46], %82 {strides = array<i32>} : memref<8x1xf32, #tpu.memory_space<vmem>>, vector<8x1xf32>,
      %c0_47 = arith.constant 0 : index
      %c0_48 = arith.constant 0 : index
      %84 = vector.load %arg10[%c0_47, %c0_48] : memref<8x1xf32, #tpu.memory_space<vmem>>, vector<8x1xf32>
      tpu.vector_store %arg10[%c0_47, %c0_48], %79 {strides = array<i32>} : memref<8x1xf32, #tpu.memory_space<vmem>>, vector<8x1xf32>,
    } else {
    }
    return
  }
  func.func @transform_0(%arg0: i32, %arg1: i32, %arg2: memref<1xi32, #tpu.memory_space<smem>>) -> (i32, i32) {
    %c0_i32 = arith.constant 0 : i32
    %c0_i32_0 = arith.constant 0 : i32
    return %arg0, %c0_i32 : i32, i32
  }
  func.func @transform_1(%arg0: i32, %arg1: i32, %arg2: memref<1xi32, #tpu.memory_space<smem>>) -> (i32, i32) {
    %c0_i32 = arith.constant 0 : i32
    %c0_i32_0 = arith.constant 0 : i32
    return %c0_i32, %arg1 : i32, i32
  }
  func.func @transform_2(%arg0: i32, %arg1: i32, %arg2: memref<1xi32, #tpu.memory_space<smem>>) -> (i32, i32) {
    %c0_i32 = arith.constant 0 : i32
    %c0_i32_0 = arith.constant 0 : i32
    return %arg0, %c0_i32 : i32, i32
  }
  func.func @transform_3(%arg0: i32, %arg1: i32, %arg2: memref<1xi32, #tpu.memory_space<smem>>) -> (i32, i32) {
    %c0_i32 = arith.constant 0 : i32
    %c0_i32_0 = arith.constant 0 : i32
    return %c0_i32, %arg1 : i32, i32
  }
  func.func @transform_4(%arg0: i32, %arg1: i32, %arg2: memref<1xi32, #tpu.memory_space<smem>>) -> (i32, i32) {
    %c0_i32 = arith.constant 0 : i32
    %c0_i32_0 = arith.constant 0 : i32
    return %arg0, %c0_i32 : i32, i32
  }
  func.func @transform_5(%arg0: i32, %arg1: i32, %arg2: memref<1xi32, #tpu.memory_space<smem>>) -> (i32, i32) {
    %c0_i32 = arith.constant 0 : i32
    %c0_i32_0 = arith.constant 0 : i32
    return %c0_i32, %arg1 : i32, i32
  }
  func.func @transform_6(%arg0: i32, %arg1: i32, %arg2: memref<1xi32, #tpu.memory_space<smem>>) -> (i32, i32) {
    %c0_i32 = arith.constant 0 : i32
    %c0_i32_0 = arith.constant 0 : i32
    return %arg0, %c0_i32 : i32, i32
  }
  func.func @transform_7(%arg0: i32, %arg1: i32, %arg2: memref<1xi32, #tpu.memory_space<smem>>) -> (i32, i32) {
    %c0_i32 = arith.constant 0 : i32
    %c0_i32_0 = arith.constant 0 : i32
    return %arg0, %c0_i32 : i32, i32
  }
}

</mosaic_0001>

<bundles_post_ra>
// kernel: tpu_custom_call.1
= control target key start
LH: loop header
LB: loop body
LE: loop exit
PB: predicated region body
PF: predicated region fallthrough
CT: control target
= control target key end

     0   :  { %v204_v0 = vmov 0   ;;  %vm48_vm1 = vcmask 261120   ;;  %v205_v8 = vmov 0.0   ;;  %vm31_vm2 = vcmask 64512   ;;  %s301_s3 = inlined_call_operand.vmem [shape: s32[8,1], index: 3, kind: input, shape index: {}]   ;;  %s302_s2 = inlined_call_operand.vmem [shape: f32[32,8], index: 2, kind: input, shape index: {}]   ;;  %s303_s5 = inlined_call_operand.vmem [shape: f32[8,1], index: 5, kind: input, shape index: {}]   ;;  %s304_s1 = inlined_call_operand.vmem [shape: f32[8,32], index: 1, kind: input, shape index: {}]   ;;  %s305_s6 = inlined_call_operand.vmem [shape: f32[1,8], index: 6, kind: input, shape index: {}]   ;;  %s306_s4 = inlined_call_operand.vmem [shape: s32[1,8], index: 4, kind: input, shape index: {}]   ;;  %s307_s0 = inlined_call_operand.<no memory space> [shape: s32[1], index: 0, kind: input, shape index: {}]   ;;  %s308_s8 = inlined_call_operand.vmem [shape: f32[8,1], index: 8, kind: output, shape index: {1}]   ;;  %s309_s7 = inlined_call_operand.vmem [shape: f32[8,1], index: 7, kind: output, shape index: {0}]  }
   0x1   :  { %196 = vset.pattern.permute.xlu0 %v204_v0  ;;  %v35_v1 = vld [vmem:[%s301_s3] sm:$0xff]  ;;  %v47_v2 = vld [vmem:[%s302_s2 + $0x18] sm:$0xff]  ;;  %v46_v3 = vld [vmem:[%s302_s2 + $0x10] sm:$0xff]  ;;  %197 = vset.pattern.permute.xlu1 %v204_v0  ;;  %34 = vst.msk [vmem:[#allocation4] sm:$0xff] %vm31_vm2, %v205_v8  ;;  %s119_s21 = scvt.s32.f32 %s307_s0  ;;  %vm177_vm6 = vcmask 7168  }
   0x2   :  { %87 = vperm.xlu0 %196, %v35_v1   ;;  %64 = vmatpush.msra.mxu0 %v47_v2  ;;  %v45_v4 = vld [vmem:[%s302_s2 + $0x8] sm:$0xff]  ;;  %v72_v5 = vld [vmem:[%s303_s5] sm:$0xff]  ;;  %vm37_vm0 = vcmp.ne.s32.totalorder %v35_v1, 100  ;;  %32 = vst.msk [vmem:[#allocation2] sm:$0xff] %vm31_vm2, %v205_v8 }
   0x3   :  { %76 = vperm.xlu1 %197, %v72_v5   ;;  %v44_v6 = vld [vmem:[%s302_s2] sm:$0xff]  ;;  %v188_v9 = vsel %vm37_vm0, 1.0, %v205_v8  ;;  %33 = vst.msk [vmem:[#allocation3] sm:$0xff] %vm31_vm2, %v205_v8  ;;  %v150_v41 = vstv %s119_s21 }
   0x4   :  { %65 = vmatpush.msra.mxu0 %v46_v3  ;;  %v43_v7 = vld [vmem:[%s304_s1] sm:$0xff] }
   0x5   :  { %v36_v10 = vld [vmem:[%s306_s4] sm:$0x1] }
   0x6   :  { %66 = vmatpush.msra.mxu0 %v45_v4  ;;  %vm40_vm3 = vcmp.ne.s32.totalorder %v36_v10, 100  ;;  %v198_v13 = vld [vmem:[%s306_s4] ss:$0 sm:$0xff] }
   0x7   :  { %v189_v12 = vsel %vm40_vm3, 1.0, %v205_v8  ;;  %v199_v21 = vld [vmem:[%s305_s6] ss:$0 sm:$0xff] }
   0x8   :  { %67 = vmatpush.msra.mxu0 %v44_v6  ;;  %v99_v14 = vperm.slane %v189_v12, 0  ;;  %v112_v18 = vld [vmem:[#allocation4] sm:$0xff] }
   0x9   :  { %190 = vmatmul.msk.f32.vlgmr.msra.gmra.mxu0 %vm48_vm1, %v43_v7  ;;  %v105_v32 = vld [vmem:[#allocation2] sm:$0xff] }
   0xa   :  { %95 = vperm.xlu0 %196, %v188_v9   ;;  %v109_v30 = vld [vmem:[#allocation3] sm:$0xff] }
  0x74   :  { %v88_v11 = vpop.permute.xlu0 %87 }
  0x75   :  { %vm90_vm4 = vcmp.eq.s32.totalorder %v88_v11, %v198_v13  ;;  %v77_v22 = vpop.permute.xlu1 %76 }
  0x76   :  { %v191_v17 = vsel %vm90_vm4, 1.0, %v205_v8  ;;  %v82_v23 = vadd.f32 %v199_v21, %v77_v22 }
  0x7c   :  { %v96_v15 = vpop.permute.xlu0 %95 }
  0x7d   :  { %v101_v16 = vmul.f32 %v99_v14, %v96_v15 }
  0x7f   :  { %v102_v19 = vmul.f32 %v191_v17, %v101_v16 }
  0x81   :  { %v113_v20 = vadd.f32 %v112_v18, %v102_v19 }
  0x83   :  { %114 = vst.msk [vmem:[#allocation4] sm:$0xff] %vm31_vm2, %v113_v20 }
  0x86   :  { %v69_v24 = vpop.f32.mrf.mxu0 }
  0x87   :  { %v83_v25 = vmul.f32 2.0, %v69_v24 }
  0x89   :  { %v84_v26 = vsub.f32 %v82_v23, %v83_v25 }
  0x8a   :  { %v128_v27 = vld [vmem:[#allocation4] sm:$0xff] }
  0x8b   :  { %v85_v28 = vmax.f32 %v84_v26, 0.0  ;;  %v129_v29 = vsel %vm31_vm2, %v128_v27, 0.0 }
  0x8c   :  { %130 = vadd.xlane.f32.xlu1 %v129_v29 }
  0x8d   :  { %v103_v31 = vmul.f32 %v101_v16, %v85_v28 }
  0x8f   :  { %v104_v33 = vmul.f32 %v191_v17, %v103_v31  ;;  %v110_v34 = vadd.f32 %v109_v30, %v103_v31 }
  0x91   :  { %v106_v35 = vadd.f32 %v105_v32, %v104_v33  ;;  %111 = vst.msk [vmem:[#allocation3] sm:$0xff] %vm31_vm2, %v110_v34 }
  0x93   :  { %108 = vst.msk [vmem:[#allocation2] sm:$0xff] %vm31_vm2, %v106_v35 }
  0x98   :  { %v124_v38 = vld [vmem:[#allocation3] sm:$0xff] }
  0x99   :  { %v125_v39 = vsel %vm31_vm2, %v124_v38, 0.0 }
  0x9a   :  { %v120_v36 = vld [vmem:[#allocation2] sm:$0xff] }
  0x9b   :  { %v121_v37 = vsel %vm31_vm2, %v120_v36, 0.0 }
  0x9c   :  { %122 = vadd.xlane.f32.xlu2 %v121_v37 }
  0xa4   :  { %126 = vadd.xlane.f32.xlu2 %v125_v39 }
  0xff   :  { %v131_v40 = vpop.xlane.xlu1 %130 }
 0x100   :  { %v132_v42 = vsub.f32 %v131_v40, %v188_v9 }
 0x102   :  { %v134_v43 = vadd.f32 1e-06, %v132_v42  ;;  %v151_v44 = vsub.f32 %v150_v41, %v132_v42  ;;  %vm171_vm5 = vcmp.gt.f32.partialorder %v132_v42, 0.5 }
 0x103   :  { %v193_v45 = vsel %vm171_vm5, 1.0, %v205_v8 }
 0x104   :  { %200 = vrcp.f32 %v134_v43  ;;  %v192_v46 = vadd.f32 -1.0, %v151_v44  ;;  %v174_v47 = vmul.f32 %v193_v45, %v188_v9  ;;  %v146_v57 = vand.u32 2147483648, %v134_v43 }
 0x105   :  { %vm140_vm8 = vweird.f32 %v134_v43  ;;  %v144_v59 = vand.u32 2147483647, %v134_v43 }
 0x106   :  { %v153_v48 = vadd.f32 1e-06, %v192_v46  ;;  %179 = vst.msk [vmem:[%s308_s8] sm:$0xff] %vm177_vm6, %v174_v47  ;;  %v147_v0 = vor.u32 1.1754944e-38, %v146_v57 }
 0x107   :  { %vm145_vm12 = vcmp.eq.f32.partialorder %v144_v59, 8.507059e+37 }
 0x108   :  { %202 = vrcp.f32 %v153_v48  ;;  %v165_v60 = vand.u32 2147483648, %v153_v48  ;;  %v163_v62 = vand.u32 2147483647, %v153_v48  ;;  %vm159_vm11 = vweird.f32 %v153_v48 }
 0x10a   :  { %v201_v49 = vpop.eup %200  ;;  %v166_v2 = vor.u32 1.1754944e-38, %v165_v60  ;;  %vm164_vm14 = vcmp.eq.f32.partialorder %v163_v62, 8.507059e+37 }
 0x10b   :  { %v136_v50 = vmul.f32 %v201_v49, %v134_v43  ;;  %vm141_vm7 = vweird.f32 %v201_v49 }
 0x10c   :  { %vm142_vm9 = vmor %vm140_vm8, %vm141_vm7 }
 0x10d   :  { %v137_v51 = vsub.f32 1.0, %v136_v50 }
 0x10e   :  { %v203_v52 = vpop.eup %202 }
 0x10f   :  { %v138_v53 = vmul.f32 %v201_v49, %v137_v51  ;;  %v123_v54 = vpop.xlane.xlu2 %122  ;;  %v155_v55 = vmul.f32 %v203_v52, %v153_v48  ;;  %vm160_vm10 = vweird.f32 %v203_v52 }
 0x110   :  { %vm161_vm13 = vmor %vm159_vm11, %vm160_vm10 }
 0x111   :  { %v139_v56 = vadd.f32 %v201_v49, %v138_v53  ;;  %v156_v58 = vsub.f32 1.0, %v155_v55 }
 0x113   :  { %v157_v61 = vmul.f32 %v203_v52, %v156_v58  ;;  %v143_v63 = vsel %vm142_vm9, %v201_v49, %v139_v56 }
 0x114   :  { %v148_v3 = vsel %vm145_vm12, %v147_v0, %v143_v63 }
 0x115   :  { %v158_v1 = vadd.f32 %v203_v52, %v157_v61  ;;  %v149_v8 = vmul.f32 %v148_v3, %v123_v54 }
 0x117   :  { %v127_v4 = vpop.xlane.xlu2 %126  ;;  %v162_v5 = vsel %vm161_vm13, %v203_v52, %v158_v1 }
 0x118   :  { %v133_v6 = vsub.f32 %v127_v4, %v123_v54  ;;  %v167_v7 = vsel %vm164_vm14, %v166_v2, %v162_v5 }
 0x11a   :  { %v168_v9 = vmul.f32 %v167_v7, %v133_v6 }
 0x11c   :  { %v169_v10 = vsub.f32 %v149_v8, %v168_v9 }
 0x11e   :  { %v170_v11 = vadd.f32 10.0, %v169_v10 }
 0x120   :  { %v175_v12 = vmax.f32 %v170_v11, 0.0 }
 0x122   :  { %v176_v13 = vmul.f32 %v175_v12, %v174_v47 }
 0x124   :  { %178 = vst.msk [vmem:[%s309_s7] sm:$0xff] %vm177_vm6, %v176_v13 }

</bundles_post_ra>
